<compile_context>
chip_gen: v5e
topology: v5e:2x2
jax: 0.10.0
libtpu: 0.0.40
codegen_flags: <defaults>
</compile_context>

<pallas_src>
import jax
import jax.numpy as jnp
import numpy as np
from jax.experimental import pallas as pl
from jax.experimental.pallas import tpu as pltpu

NUM_OBJ = 80     # object detector classes (HICO-DET uses 80)
NUM_HOI = 600    # HOI classes (HICO-DET uses 600)

TILE_N_MAX = 2048   # row tile cap for large N (fits all generations' VMEM easily)
SUBLANE = 8


def _round_up(x, m):
    return ((x + m - 1) // m) * m


# ---------------------------------------------------------------------------
# Kernel (obj stream): out[n, h] = o_conf[n, obj_of_hoi[h]] == o_conf @ one_hot
# (MXU one-hot matmul is an exact lane-axis gather; kernel is store-bound,
#  the matmul cost is irrelevant -- K=80 underfilling the MXU doesn't matter.)
# ---------------------------------------------------------------------------

def _scatter_obj_kernel(o_ref, m_ref, out_ref):
    out_ref[...] = jnp.dot(
        o_ref[...], m_ref[...], preferred_element_type=jnp.float32
    ).astype(out_ref.dtype)


def scatter_obj_to_hoi(o_conf, scatter_mat, out_dtype=None):
    """o_conf: [N, C] float -> [N, H] via precomputed one-hot scatter_mat [C, H]."""
    N, C = o_conf.shape
    H = scatter_mat.shape[1]
    out_dtype = o_conf.dtype if out_dtype is None else out_dtype
    out_bytes = jnp.dtype(out_dtype).itemsize

    # >= 2 grid steps when possible so both v7x TensorCores get rows; no row
    # padding -- Pallas masks the ragged last block.
    tile_n = max(SUBLANE, min(TILE_N_MAX, _round_up(pl.cdiv(N, 2), SUBLANE)))
    grid = (pl.cdiv(N, tile_n),)

    # double-buffered input + output tiles, double-buffered resident matrix, headroom
    vmem_bytes = int(
        2 * (tile_n * C * 4 + tile_n * H * out_bytes) + 2 * (C * H * 4) + (4 << 20)
    )

    cost = pl.CostEstimate(
        flops=2 * N * C * H,
        transcendentals=0,
        bytes_accessed=N * C * 4 + C * H * 4 + N * H * out_bytes,
    )

    return pl.pallas_call(
        _scatter_obj_kernel,
        out_shape=jax.ShapeDtypeStruct((N, H), out_dtype),
        grid=grid,
        in_specs=[
            pl.BlockSpec((tile_n, C), lambda i: (i, 0)),
            pl.BlockSpec((C, H), lambda i: (0, 0)),   # resident across the row grid
        ],
        out_specs=pl.BlockSpec((tile_n, H), lambda i: (i, 0)),
        compiler_params=pltpu.CompilerParams(
            dimension_semantics=("parallel",),
            vmem_limit_bytes=vmem_bytes,
        ),
        cost_estimate=cost,
    )(o_conf, scatter_mat)


# ---------------------------------------------------------------------------
# hum stream: plain broadcast (review: Pallas launch overhead > work; XLA fuses
# this into the consumer and can skip the HBM materialization entirely).
# ---------------------------------------------------------------------------

def scatter_hum_to_hoi(h_conf_col, num_hoi, out_dtype=None):
    """h_conf_col: [N, 1] -> [N, num_hoi] by broadcast (no custom kernel)."""
    out = jnp.broadcast_to(h_conf_col, (h_conf_col.shape[0], num_hoi))
    if out_dtype is not None:
        out = out.astype(out_dtype)
    return out


# ---------------------------------------------------------------------------
# Module
# ---------------------------------------------------------------------------

class ConfBlock:
    """JAX/Pallas port of consnet ConfBlock. No learnable parameters.

    out_dtype=jnp.bfloat16 halves output store bandwidth (the binding resource)
    if the downstream consumer tolerates bf16; default float32 matches torch.
    """

    def __init__(self, stream, hoi_to_obj, num_obj=NUM_OBJ, num_hoi=NUM_HOI,
                 out_dtype=None):
        self._stream = stream
        self._num_hoi = num_hoi
        self._out_dtype = out_dtype
        if stream == 'h_conf':
            self._scatter_mat = None
        else:
            # Static one-hot [C, H]: M[c, h] = 1 iff HOI h's object class == c.
            # Built once with numpy (hoisted out of the per-call path).
            hoi_to_obj_np = np.asarray(hoi_to_obj, dtype=np.int32)
            mat = np.zeros((num_obj, num_hoi), dtype=np.float32)
            mat[hoi_to_obj_np, np.arange(num_hoi)] = 1.0
            self._scatter_mat = jnp.asarray(mat)

    def __call__(self, data):
        # TODO(synk): fuse this block into the downstream consumer so the
        # [N, num_hoi] confidence map is never materialized in HBM.
        if self._stream == 'h_conf':
            # torch: data['h_conf'][:, None, 0] -> shape [N, 1]
            h = data['h_conf'][:, 0:1]
            return scatter_hum_to_hoi(h, self._num_hoi, self._out_dtype)
        else:
            return scatter_obj_to_hoi(data['o_conf'], self._scatter_mat,
                                      self._out_dtype)


if __name__ == "__main__":
    key = jax.random.PRNGKey(0)
    k1, k2 = jax.random.split(key)
    N = 50  # deliberately not a multiple of 8 — exercises the ragged last row block

    # Deterministic synthetic HOI -> object-class correspondence table
    # (stand-in for the HICO-DET mapping used by scatter_obj_to_hoi).
    hoi_to_obj = jnp.arange(NUM_HOI, dtype=jnp.int32) % NUM_OBJ

    o_conf = jax.nn.softmax(jax.random.normal(k1, (N, NUM_OBJ), jnp.float32), axis=-1)
    h_conf = jax.nn.sigmoid(jax.random.normal(k2, (N, 2), jnp.float32))
    data = {'o_conf': o_conf, 'h_conf': h_conf}

    out_o = jax.block_until_ready(ConfBlock('o_conf', hoi_to_obj)(data))
    out_h = jax.block_until_ready(ConfBlock('h_conf', hoi_to_obj)(data))

    # Pure-JAX references.
    ref_o = jnp.take(o_conf, hoi_to_obj, axis=1)
    ref_h = jnp.broadcast_to(h_conf[:, 0:1], (N, NUM_HOI))

    assert out_o.shape == (N, NUM_HOI) and out_h.shape == (N, NUM_HOI)
    np.testing.assert_allclose(np.asarray(out_o), np.asarray(ref_o), rtol=1e-6, atol=1e-6)
    np.testing.assert_allclose(np.asarray(out_h), np.asarray(ref_h), rtol=1e-6, atol=1e-6)
    print("KERNEL_OK")
</pallas_src>

<mosaic_0001>
module attributes {stable_mosaic.version = 11 : i64} {
  func.func @_scatter_obj_kernel(%arg0: i32, %arg1: memref<32x80xf32, #tpu.memory_space<vmem>>, %arg2: memref<80x600xf32, #tpu.memory_space<vmem>>, %arg3: memref<32x600xf32, #tpu.memory_space<vmem>>) attributes {dimension_semantics = [#tpu.dimension_semantics<parallel>], iteration_bounds = array<i64: 2>, scalar_prefetch = 0 : i64, scratch_operands = 0 : i64, tpu.core_type = #tpu.core_type<tc>, window_params = [{transform_indices = @transform_0, window_bounds = array<i64: 32, 80>}, {pipeline_mode = #tpu.pipeline_mode<synchronous>, transform_indices = @transform_1, window_bounds = array<i64: 80, 600>}, {transform_indices = @transform_2, window_bounds = array<i64: 32, 600>}]} {
    %c0 = arith.constant 0 : index
    %c0_0 = arith.constant 0 : index
    %0 = vector.load %arg1[%c0, %c0_0] : memref<32x80xf32, #tpu.memory_space<vmem>>, vector<32x80xf32>
    %c0_1 = arith.constant 0 : index
    %c0_2 = arith.constant 0 : index
    %1 = vector.load %arg2[%c0_1, %c0_2] : memref<80x600xf32, #tpu.memory_space<vmem>>, vector<80x600xf32>
    %cst = arith.constant dense<0.000000e+00> : vector<32x600xf32>
    %2 = tpu.matmul %0, %1, %cst {dimension_numbers = #tpu.dot_dimension_numbers<[1], [0], [0], [1], [0, 0, 1, 1], [], []>} : vector<32x80xf32>, vector<80x600xf32>, vector<32x600xf32> -> vector<32x600xf32>
    %c0_3 = arith.constant 0 : index
    %c0_4 = arith.constant 0 : index
    %3 = vector.load %arg3[%c0_3, %c0_4] : memref<32x600xf32, #tpu.memory_space<vmem>>, vector<32x600xf32>
    tpu.vector_store %arg3[%c0_3, %c0_4], %2 {strides = array<i32>} : memref<32x600xf32, #tpu.memory_space<vmem>>, vector<32x600xf32>,
    return
  }
  func.func @transform_0(%arg0: i32) -> (i32, i32) {
    %c0_i32 = arith.constant 0 : i32
    %c0_i32_0 = arith.constant 0 : i32
    return %arg0, %c0_i32 : i32, i32
  }
  func.func @transform_1(%arg0: i32) -> (i32, i32) {
    %c0_i32 = arith.constant 0 : i32
    %c0_i32_0 = arith.constant 0 : i32
    %c0_i32_1 = arith.constant 0 : i32
    return %c0_i32, %c0_i32_0 : i32, i32
  }
  func.func @transform_2(%arg0: i32) -> (i32, i32) {
    %c0_i32 = arith.constant 0 : i32
    %c0_i32_0 = arith.constant 0 : i32
    return %arg0, %c0_i32 : i32, i32
  }
}

</mosaic_0001>

<bundles_post_ra>
// kernel: tpu_custom_call.1
= control target key start
LH: loop header
LB: loop body
LE: loop exit
PB: predicated region body
PF: predicated region fallthrough
CT: control target
= control target key end

     0   :  { %7 = vsyncpa [#allocation3], 0  ;;  %s1094_s0 = inlined_call_operand.hbm [shape: f32[50,80], index: 0, kind: input, shape index: {}]   ;;  %s1095_s1 = inlined_call_operand.hbm [shape: f32[80,600], index: 1, kind: input, shape index: {}]   ;;  %s1096_s2 = inlined_call_operand.hbm [shape: f32[50,600], index: 2, kind: output, shape index: {}]  }
   0x1   :  { %9 = vsyncpa [#allocation3 + $0x1], 0 }
   0x2   :  { %10 = vsyncpa [#allocation6], 0 }
   0x3   :  { %11 = vsyncpa [#allocation4], 0 }
   0x4   :  { %13 = vsyncpa [#allocation4 + $0x1], 0  ;;  %s838_s9 = smov 0   ;;  %s840_s10 = smov 0  }
   0x5   :  { %s842_s11 = smov 0   ;;  %s844_s12 = smov 0  }
   0x6 LB: > { %s859_s13 = sadd.s32 4294967295, %s812_s12   ;;  %s540_s14 = sadd.s32 4294967294, %s812_s12   ;;  %s812_s12 = sphi %s844_s12, %s1113_s12   ;;  %s808_s11 = sphi %s842_s11, %s1112_s11   ;;  %s804_s10 = sphi %s840_s10, %s1111_s10   ;;  %s800_s9 = sphi %s838_s9, %s1110_s9  }
   0x7   : > { %s863_s15 = sadd.s32 1, %s812_s12   ;;  %s26_s16 = sadd.s32 1, %s808_s11 }
   0x8   : > { %s23_s17 = ssub.s32 %s812_s12, %s863_s15  ;;  %p33_p0 = scmp.ne.s32.totalorder %s808_s11, %s804_s10 }
   0x9   : > { %p24_p1 = scmp.eq.s32.totalorder %s23_s17, 0  ;;  %p34_p2 = scmp.eq.s32.totalorder %s812_s12, 0 }
   0xa   : > { %p39_p3 = scmp.ne.s32.totalorder %s804_s10, %s800_s9  ;;  %p1098_p4 = scmp.eq.s32.totalorder %s859_s13, 0 }
   0xb   : > { %s875_s18 = scalar_select %p24_p1, %s808_s11, %s26_s16  }
   0xc   : > { %p877_p5 = por %p34_p2, %p33_p0  ;;  %p883_p6 = por %p1098_p4, %p39_p3 }
   0xd   : > { %p84_p7 = scmp.eq.s32.totalorder %s859_s13, 1  ;;  %p90_p8 = scmp.eq.s32.totalorder %s540_s14, 1 }
   0xe   : > { %p541_p9 = scmp.ge.s32.totalorder %s812_s12, 1  ;;  %p97_p10 = scmp.lt.s32.totalorder %s812_s12, 3 }
   0xf   : > { %p890_p11 = por %p84_p7, %p33_p0  ;;  %p894_p12 = por %p90_p8, %p39_p3 }
  0x10   : > { %p898_p13 = pnand %p541_p9, %p97_p10  ;;  %s108_s26 = sshll.u32 %s1095_s1, 4  ;;  %s109_s26 = int_to_ptr.hbm [resolvable:$true] %s108_s26 }
  0x11   : > { %s1102_s22 = scalar_select %p894_p12, 1, 0 }
  0x12   : > { %p612_p1 = pneg %p898_p13  ;;  %s814_s27 = smov [#allocation5]  }
  0x13   : > { %s110_s28 = sshll.u32 %s814_s27, 4  ;;  %s815_s29 = smov 640   ;;  %s111_s28 = int_to_ptr.vmem [resolvable:$true] %s110_s28 }
  0x14   : > { %p613_p0 = pnand %p612_p1, %p1098_p4  ;;  %s816_s30 = smov 40  }
  0x15   : > { %p1097_p2 = scmp.ge.s32.totalorder %s812_s12, 2 }
  0x16   : > { %615 = dma.hbm_to_vmem [thread:$0]  (!%p613_p0), %s109_s26, 6400, %s111_s28, [#allocation6], %s815_s29, %s815_s29, %s816_s30  }
  0x17   : > { %120 = sbr.rel (%p1097_p2) target bundleno = 64 (0x40), region = 20 }
  0x1c   : > { %123 = sbr.rel (!%p877_p5) target bundleno = 64 (0x40), region = 24  ;;  %s124_s3 = sand.u32 (%p877_p5), 1, %s808_s11  }
  0x1d   : > { %s545_s4 = sshll.u32 (%p877_p5), %s812_s12, 2  ;;  %s544_s5 = sshll.u32 (%p877_p5), %s124_s3, 5 }
  0x1e   : > { %s130_s6 = ssub.s32 (%p877_p5), 7, %s545_s4  ;;  %s919_s16 = scalar_lea.sflag (%p877_p5), [#allocation3], %s124_s3 }
  0x1f   : > { %p131_p3 = scmp.lt.s32.totalorder (%p877_p5), %s130_s6, 4  ;;  %s128_s17 = scalar_lea.vmem (%p877_p5), [#allocation2], %s544_s5 }
  0x21   : > { %s1115_s6 = smov (!%p131_p3, %s130_s6), 4 }
  0x22   : > { %s546_s7 = sshll.u32 %s1115_s6, 3 }
  0x23   : > { %s134_s8 = ssub.s32 32, %s546_s7 }
  0x24   : > { %s135_s14 = sshll.u32 %s134_s8, 4 }
  0x25   : > { %136 = vsyncadd %s919_s16, %s135_s14  ;;  %p922_p5 = scmp.ne.s32.totalorder %s546_s7, 0  ;;  %s583_s24 = sshll.u32 %s812_s12, 5 }
  0x26   : > { %s139_s27 = scalar_lea.hbm %s1094_s0, %s583_s24  ;;  %s930_s28 = sshll.u32 %s128_s17, 4  ;;  %s144_s28 = int_to_ptr.vmem [resolvable:$true] %s930_s28 }
  0x27   : > { %s141_s29 = sshll.u32 %s139_s27, 4  ;;  %s550_s30 = sshll.u32 %s1115_s6, 7  ;;  %s933_s29 = int_to_ptr.hbm [resolvable:$true] %s141_s29 }
  0x28   : > { %s692_s3 = sshra.s32 %s933_s29, 4  ;;  %s694_s4 = sshrl.u32 %s550_s30, 4  ;;  %s693_s3 = int_to_ptr.hbm [resolvable:$true] %s692_s3 }
  0x29   : > { %s699_s5 = scalar_lea.hbm %s693_s3, %s694_s4  ;;  %s703_s14 = scalar_lea.hbm %s1094_s0, 56 }
  0x2a   : > { %p700_p7 = scmp.ne.s32.totalorder %s693_s3, %s699_s5  ;;  %p704_p10 = scmp.lt.s32.totalorder %s693_s3, %s1094_s0 }
  0x2b   : > { %p705_p1 = scmp.lt.s32.totalorder %s703_s14, %s699_s5 }
  0x2c   : > { %p701_p8 = pnand %p700_p7, %p922_p5 }
  0x2d   : > { %p706_p0 = por %p705_p1, %p704_p10 }
  0x2e   : > { %p702_p9 = pneg %p701_p8 }
  0x30   : > { %p707_p3 = pnand %p706_p0, %p702_p9 }
  0x32   : > { %710 = shalt.err (!%p707_p3)
}
  0x33   : > { %s711_s25 = sshra.s32 %s144_s28, 4  ;;  %s817_s27 = smov [#allocation2]   ;;  %s712_s25 = int_to_ptr.vmem [resolvable:$true] %s711_s25 }
  0x34   : > { %s718_s26 = scalar_lea.vmem %s712_s25, %s694_s4  ;;  %s722_s7 = scalar_lea.vmem %s817_s27, 64 }
  0x35   : > { %p719_p7 = scmp.ne.s32.totalorder %s712_s25, %s718_s26  ;;  %p724_p4 = scmp.lt.s32.totalorder %s722_s7, %s718_s26 }
  0x37   : > { %p720_p8 = pnand %p719_p7, %p922_p5 }
  0x39   : > { %p721_p2 = pneg %p720_p8 }
  0x3b   : > { %p726_p12 = pnand %p724_p4, %p721_p2 }
  0x3d   : > { %729 = shalt.err (!%p726_p12)
}
  0x3e   : > { %s818_s3 = smov 128   ;;  %s819_s5 = smov 8  }
  0x3f   : > { %149 = dma.hbm_to_vmem [thread:$0]  (%p922_p5), %s933_s29, %s550_s30, %s144_s28, %s919_s16, %s818_s3, %s818_s3, %s819_s5  }
  0x40 PF: > { %155 = sbr.rel (%p898_p13) target bundleno = 300 (0x12c), region = 28  ;;  %s962_s4 = sand.u32 (!%p898_p13), 1, %s804_s10  }
  0x41   : > { %s552_s8 = sshll.u32 (!%p898_p13), %s962_s4, 5  ;;  %s158_s14 = scalar_lea.sflag (!%p898_p13), [#allocation3], %s962_s4 }
  0x42   : > { %s966_s17 = scalar_lea.vmem (!%p898_p13), [#allocation2], %s552_s8 }
  0x45   : > { %787 = dma.done.wait (%p883_p6), %s158_s14, 512  }
  0x46   : > { %789 = vsyncadd (%p883_p6), %s158_s14, 4294966784  ;;  %p1105_p4 = scmp.eq.s32.totalorder %s859_s13, 0 }
  0x48   : > { %791 = dma.done.wait (%p1105_p4), [#allocation6], 6400   ;;  %p1106_p12 = pmov %p1105_p4 }
  0x49   : > { %v248_v0 = vld [vmem:[#allocation5 + $0x168] sm:$0xff]  ;;  %v243_v1 = vld [vmem:[#allocation5 + $0x140] sm:$0xff]  ;;  %v250_v2 = vld [vmem:[#allocation5 + $0x178] sm:$0xff]  ;;  %vm253_vm0 = vcmask 654336   ;;  %s604_s20 = smul.u32 160, %s962_s4  ;;  %vm415_vm1 = vcmask 719872  }
  0x4a   : > { %793 = vsyncadd (%p1106_p12), [#allocation6], 4294960896  ;;  %584 = vmatpush.msra.mxu1 %v248_v0  ;;  %272 = vmatpush.msra.mxu0 %v248_v0  ;;  %v245_v3 = vld [vmem:[#allocation5 + $0x150] sm:$0xff]  ;;  %v238_v4 = vld [vmem:[#allocation5 + $0x118] sm:$0xff]  ;;  %s433_s6 = scalar_lea.sflag [#allocation4], %s962_s4  ;;  %s574_s16 = sshll.u32 (%p890_p11), %s859_s13, 2 }
  0x4b   : > { %330 = vmatpush.msra.mxu2 %v250_v2  ;;  %v240_v5 = vld [vmem:[#allocation5 + $0x128] sm:$0xff]  ;;  %v233_v6 = vld [vmem:[#allocation5 + $0xf0] sm:$0xff]  ;;  %v251_v7 = vld [vmem:[#allocation5 + $0x180] sm:$0xff]  ;;  %s1008_s23 = scalar_lea.vmem [#allocation7], %s604_s20  ;;  %s441_s19 = ssub.s32 (%p890_p11), 7, %s574_s16 }
  0x4c   : > { %585 = vmatpush.msra.mxu1 %v243_v1  ;;  %273 = vmatpush.msra.mxu0 %v243_v1  ;;  %v235_v8 = vld [vmem:[#allocation5 + $0x100] sm:$0xff]  ;;  %v246_v9 = vld [vmem:[#allocation5 + $0x158] sm:$0xff]  ;;  %v228_v10 = vld [vmem:[#allocation5 + $0xc8] sm:$0xff]  ;;  %p442_p6 = scmp.lt.s32.totalorder (%p890_p11), %s441_s19, 4 }
  0x4d   : > { %331 = vmatpush.msra.mxu2 %v245_v3  ;;  %359 = vmatpush.msra.mxu3 %v251_v7  ;;  %v230_v11 = vld [vmem:[#allocation5 + $0xd8] sm:$0xff]  ;;  %v241_v12 = vld [vmem:[#allocation5 + $0x130] sm:$0xff]  ;;  %v223_v13 = vld [vmem:[#allocation5 + $0xa0] sm:$0xff] }
  0x4e   : > { %586 = vmatpush.msra.mxu1 %v238_v4  ;;  %274 = vmatpush.msra.mxu0 %v238_v4  ;;  %v225_v14 = vld [vmem:[#allocation5 + $0xb0] sm:$0xff]  ;;  %v236_v15 = vld [vmem:[#allocation5 + $0x108] sm:$0xff]  ;;  %v218_v16 = vld [vmem:[#allocation5 + $0x78] sm:$0xff] }
  0x4f   : > { %332 = vmatpush.msra.mxu2 %v240_v5  ;;  %360 = vmatpush.msra.mxu3 %v246_v9  ;;  %v220_v17 = vld [vmem:[#allocation5 + $0x88] sm:$0xff]  ;;  %v231_v18 = vld [vmem:[#allocation5 + $0xe0] sm:$0xff]  ;;  %v213_v19 = vld [vmem:[#allocation5 + $0x50] sm:$0xff] }
  0x50   : > { %587 = vmatpush.msra.mxu1 %v233_v6  ;;  %275 = vmatpush.msra.mxu0 %v233_v6  ;;  %v215_v20 = vld [vmem:[#allocation5 + $0x60] sm:$0xff]  ;;  %v226_v21 = vld [vmem:[#allocation5 + $0xb8] sm:$0xff]  ;;  %v208_v22 = vld [vmem:[#allocation5 + $0x28] sm:$0xff] }
  0x51   : > { %333 = vmatpush.msra.mxu2 %v235_v8  ;;  %361 = vmatpush.msra.mxu3 %v241_v12  ;;  %v210_v23 = vld [vmem:[#allocation5 + $0x38] sm:$0xff]  ;;  %v221_v24 = vld [vmem:[#allocation5 + $0x90] sm:$0xff]  ;;  %v203_v25 = vld [vmem:[#allocation5] sm:$0xff] }
  0x52   : > { %588 = vmatpush.msra.mxu1 %v228_v10  ;;  %276 = vmatpush.msra.mxu0 %v228_v10  ;;  %v249_v26 = vld [vmem:[#allocation5 + $0x170] sm:$0xff]  ;;  %v977_v27 = vld [vmem:[%s966_s17] sm:$0xff]  ;;  %v252_v28 = vld [vmem:[#allocation5 + $0x188] sm:$0xff] }
  0x53   : > { %334 = vmatpush.msra.mxu2 %v230_v11  ;;  %362 = vmatpush.msra.mxu3 %v236_v15  ;;  %v205_v29 = vld [vmem:[#allocation5 + $0x10] sm:$0xff]  ;;  %v244_v30 = vld [vmem:[#allocation5 + $0x148] sm:$0xff]  ;;  %v247_v31 = vld [vmem:[#allocation5 + $0x160] sm:$0xff] }
  0x54   : > { %589 = vmatpush.msra.mxu1 %v223_v13  ;;  %277 = vmatpush.msra.mxu0 %v223_v13  ;;  %v239_v32 = vld [vmem:[#allocation5 + $0x120] sm:$0xff]  ;;  %v216_v33 = vld [vmem:[#allocation5 + $0x68] sm:$0xff]  ;;  %v242_v34 = vld [vmem:[#allocation5 + $0x138] sm:$0xff] }
  0x55   : > { %335 = vmatpush.msra.mxu2 %v225_v14  ;;  %363 = vmatpush.msra.mxu3 %v231_v18  ;;  %v234_v35 = vld [vmem:[#allocation5 + $0xf8] sm:$0xff]  ;;  %v211_v36 = vld [vmem:[#allocation5 + $0x40] sm:$0xff]  ;;  %v237_v38 = vld [vmem:[#allocation5 + $0x110] sm:$0xff] }
  0x56   : > { %590 = vmatpush.msra.mxu1 %v218_v16  ;;  %278 = vmatpush.msra.mxu0 %v218_v16  ;;  %v202_v37 = vld [vmem:[%s966_s17 + $0x18] sm:$0xff]  ;;  %v229_v39 = vld [vmem:[#allocation5 + $0xd0] sm:$0xff]  ;;  %v200_v40 = vld [vmem:[%s966_s17 + $0x8] sm:$0xff] }
  0x57   : > { %336 = vmatpush.msra.mxu2 %v220_v17  ;;  %364 = vmatpush.msra.mxu3 %v226_v21  ;;  %v206_v41 = vld [vmem:[#allocation5 + $0x18] sm:$0xff]  ;;  %v224_v42 = vld [vmem:[#allocation5 + $0xa8] sm:$0xff]  ;;  %v219_v44 = vld [vmem:[#allocation5 + $0x80] sm:$0xff] }
  0x58   : > { %591 = vmatpush.msra.mxu1 %v213_v19  ;;  %279 = vmatpush.msra.mxu0 %v213_v19  ;;  %v232_v43 = vld [vmem:[#allocation5 + $0xe8] sm:$0xff]  ;;  %v227_v45 = vld [vmem:[#allocation5 + $0xc0] sm:$0xff]  ;;  %v214_v46 = vld [vmem:[#allocation5 + $0x58] sm:$0xff] }
  0x59   : > { %337 = vmatpush.msra.mxu2 %v215_v20  ;;  %365 = vmatpush.msra.mxu3 %v221_v24  ;;  %v222_v47 = vld [vmem:[#allocation5 + $0x98] sm:$0xff]  ;;  %v209_v48 = vld [vmem:[#allocation5 + $0x30] sm:$0xff]  ;;  %v204_v51 = vld [vmem:[#allocation5 + $0x8] sm:$0xff] }
  0x5a   : > { %592 = vmatpush.msra.mxu1 %v208_v22  ;;  %280 = vmatpush.msra.mxu0 %v208_v22  ;;  %v201_v49 = vld [vmem:[%s966_s17 + $0x10] sm:$0xff]  ;;  %v212_v52 = vld [vmem:[#allocation5 + $0x48] sm:$0xff]  ;;  %v207_v53 = vld [vmem:[#allocation5 + $0x20] sm:$0xff] }
  0x5b   : > { %338 = vmatpush.msra.mxu2 %v210_v23  ;;  %366 = vmatpush.msra.mxu3 %v216_v33  ;;  %v217_v50 = vld [vmem:[#allocation5 + $0x70] sm:$0xff] }
  0x5c   : > { %593 = vmatpush.msra.mxu1 %v203_v25  ;;  %281 = vmatpush.msra.mxu0 %v203_v25 }
  0x5d   : > { %554 = vmatmul.msk.f32.vlgmr.msra.gmra.mxu0 %vm253_vm0, %v977_v27  ;;  %339 = vmatpush.msra.mxu2 %v205_v29 }
  0x5e   : > { %301 = vmatpush.msrb.mxu1 %v249_v26  ;;  %388 = vmatpush.msrb.mxu0 %v252_v28 }
  0x5f   : > { %562 = vmatmul.msk.f32.vlgmr.msra.gmra.mxu2 %vm253_vm0, %v977_v27  ;;  %367 = vmatpush.msra.mxu3 %v211_v36 }
  0x60   : > { %302 = vmatpush.msrb.mxu1 %v244_v30  ;;  %594 = vmatpush.msrb.mxu2 %v252_v28 }
  0x61   : > { %389 = vmatpush.msrb.mxu0 %v247_v31  ;;  %557 = vmatmul.msk.f32.vlgmr.msra.gmra.mxu1 %vm253_vm0, %v202_v37 }
  0x62   : > { %303 = vmatpush.msrb.mxu1 %v239_v32  ;;  %595 = vmatpush.msrb.mxu2 %v247_v31 }
  0x63   : > { %390 = vmatpush.msrb.mxu0 %v242_v34  ;;  %368 = vmatpush.msra.mxu3 %v206_v41 }
  0x64   : > { %304 = vmatpush.msrb.mxu1 %v234_v35  ;;  %596 = vmatpush.msrb.mxu2 %v242_v34 }
  0x65   : > { %391 = vmatpush.msrb.mxu0 %v237_v38  ;;  %566 = vmatmul.msk.f32.vlgmr.msra.gmra.mxu3 %vm253_vm0, %v977_v27 }
  0x66   : > { %305 = vmatpush.msrb.mxu1 %v229_v39  ;;  %555 = vmatmul.msk.f32.gmra.mxu0 %vm253_vm0, %v200_v40 }
  0x67   : > { %563 = vmatmul.msk.f32.gmra.mxu2 %vm253_vm0, %v200_v40  ;;  %392 = vmatpush.msrb.mxu0 %v232_v43 }
  0x68   : > { %306 = vmatpush.msrb.mxu1 %v224_v42  ;;  %597 = vmatpush.msrb.mxu2 %v237_v38 }
  0x69   : > { %393 = vmatpush.msrb.mxu0 %v227_v45 }
  0x6a   : > { %307 = vmatpush.msrb.mxu1 %v219_v44  ;;  %598 = vmatpush.msrb.mxu2 %v232_v43 }
  0x6b   : > { %394 = vmatpush.msrb.mxu0 %v222_v47 }
  0x6c   : > { %308 = vmatpush.msrb.mxu1 %v214_v46  ;;  %599 = vmatpush.msrb.mxu2 %v227_v45 }
  0x6d   : > { %395 = vmatpush.msrb.mxu0 %v217_v50  ;;  %567 = vmatmul.msk.f32.gmra.mxu3 %vm253_vm0, %v200_v40 }
  0x6e   : > { %309 = vmatpush.msrb.mxu1 %v209_v48  ;;  %556 = vmatmul.msk.f32.gmra.mxu0 %vm253_vm0, %v201_v49 }
  0x6f   : > { %564 = vmatmul.msk.f32.gmra.mxu2 %vm253_vm0, %v201_v49  ;;  %396 = vmatpush.msrb.mxu0 %v212_v52 }
  0x70   : > { %310 = vmatpush.msrb.mxu1 %v204_v51  ;;  %600 = vmatpush.msrb.mxu2 %v222_v47 }
  0x71   : > { %558 = vmatmul.msk.f32.vlgmr.msrb.gmra.mxu1 %vm253_vm0, %v977_v27  ;;  %397 = vmatpush.msrb.mxu0 %v207_v53 }
  0x72   : > { %601 = vmatpush.msrb.mxu2 %v217_v50 }
  0x74   : > { %602 = vmatpush.msrb.mxu2 %v212_v52 }
  0x75   : > { %568 = vmatmul.msk.f32.gmra.mxu3 %vm253_vm0, %v201_v49 }
  0x76   : > { %570 = vmatmul.msk.f32.vlgmr.msrb.gmra.mxu0 %vm253_vm0, %v977_v27  ;;  %603 = vmatpush.msrb.mxu2 %v207_v53 }
  0x77   : > { %565 = vmatmul.msk.f32.gmra.mxu2 %vm253_vm0, %v202_v37 }
  0x79   : > { %559 = vmatmul.msk.f32.gmra.mxu1 %vm253_vm0, %v200_v40 }
  0x7d   : > { %569 = vmatmul.msk.f32.gmra.mxu3 %vm253_vm0, %v202_v37 }
  0x7e   : > { %571 = vmatmul.msk.f32.gmra.mxu0 %vm253_vm0, %v200_v40 }
  0x7f   : > { %573 = vmatmul.msk.f32.vlgmr.msrb.gmra.mxu2 %vm253_vm0, %v202_v37 }
  0x81   : > { %560 = vmatmul.msk.f32.gmra.mxu1 %vm253_vm0, %v201_v49 }
  0x86   : > { %572 = vmatmul.msk.f32.gmra.mxu0 %vm253_vm0, %v201_v49 }
  0x89   : > { %561 = vmatmul.msk.f32.gmra.mxu1 %vm253_vm0, %v202_v37 }
  0xda   : > { %v283_v54 = vpop.f32.mrf.mxu0 }
  0xdb   : > { %411 = vst [vmem:[%s1008_s23] sm:$0xff] %v283_v54 }
  0xde   : > { %v292_v55 = vpop.f32.mrf.mxu1 }
  0xdf   : > { %427 = vst [vmem:[%s1008_s23 + $0x78] sm:$0xff] %v292_v55 }
  0xe2   : > { %v341_v57 = vpop.f32.mrf.mxu2 }
  0xe3   : > { %v286_v56 = vpop.f32.mrf.mxu0  ;;  %413 = vst [vmem:[%s1008_s23 + $0x10] sm:$0xff] %v341_v57 }
  0xe4   : > { %417 = vst [vmem:[%s1008_s23 + $0x28] sm:$0xff] %v286_v56 }
  0xe8   : > { %v370_v60 = vpop.f32.mrf.mxu3 }
  0xe9   : > { %414 = vst [vmem:[%s1008_s23 + $0x18] sm:$0xff] %v370_v60 }
  0xea   : > { %v344_v59 = vpop.f32.mrf.mxu2 }
  0xeb   : > { %v289_v58 = vpop.f32.mrf.mxu0  ;;  %419 = vst [vmem:[%s1008_s23 + $0x38] sm:$0xff] %v344_v59 }
  0xec   : > { %422 = vst [vmem:[%s1008_s23 + $0x50] sm:$0xff] %v289_v58 }
  0xee   : > { %v312_v61 = vpop.f32.mrf.mxu1 }
  0xef   : > { %412 = vst [vmem:[%s1008_s23 + $0x8] sm:$0xff] %v312_v61 }
  0xf0   : > { %v373_v0 = vpop.f32.mrf.mxu3 }
  0xf1   : > { %420 = vst [vmem:[%s1008_s23 + $0x40] sm:$0xff] %v373_v0 }
  0xf2   : > { %v347_v62 = vpop.f32.mrf.mxu2 }
  0xf3   : > { %v399_v63 = vpop.f32.mrf.mxu0  ;;  %424 = vst [vmem:[%s1008_s23 + $0x60] sm:$0xff] %v347_v62 }
  0xf4   : > { %416 = vst.msk [vmem:[%s1008_s23 + $0x20] sm:$0xff] %vm415_vm1, %v399_v63 }
  0xf6   : > { %v315_v1 = vpop.f32.mrf.mxu1 }
  0xf7   : > { %418 = vst [vmem:[%s1008_s23 + $0x30] sm:$0xff] %v315_v1 }
  0xf8   : > { %v376_v4 = vpop.f32.mrf.mxu3 }
  0xf9   : > { %425 = vst [vmem:[%s1008_s23 + $0x68] sm:$0xff] %v376_v4 }
  0xfa   : > { %v350_v2 = vpop.f32.mrf.mxu2 }
  0xfb   : > { %v402_v3 = vpop.f32.mrf.mxu0  ;;  %429 = vst [vmem:[%s1008_s23 + $0x88] sm:$0xff] %v350_v2 }
  0xfc   : > { %421 = vst.msk [vmem:[%s1008_s23 + $0x48] sm:$0xff] %vm415_vm1, %v402_v3 }
  0xfe   : > { %v318_v5 = vpop.f32.mrf.mxu1 }
  0xff   : > { %423 = vst [vmem:[%s1008_s23 + $0x58] sm:$0xff] %v318_v5 }
 0x100   : > { %v379_v8 = vpop.f32.mrf.mxu3 }
 0x101   : > { %430 = vst [vmem:[%s1008_s23 + $0x90] sm:$0xff] %v379_v8 }
 0x102   : > { %v408_v7 = vpop.f32.mrf.mxu2 }
 0x103   : > { %v405_v6 = vpop.f32.mrf.mxu0  ;;  %431 = vst.msk [vmem:[%s1008_s23 + $0x98] sm:$0xff] %vm415_vm1, %v408_v7  ;;  %439 = sbr.rel (!%p890_p11) target bundleno = 300 (0x12c), region = 40 }
 0x104   : > { %426 = vst.msk [vmem:[%s1008_s23 + $0x70] sm:$0xff] %vm415_vm1, %v405_v6 }
 0x106   : > { %v321_v9 = vpop.f32.mrf.mxu1 }
 0x107   : > { %428 = vst [vmem:[%s1008_s23 + $0x80] sm:$0xff] %v321_v9 }
 0x108   : > { %s1117_s19 = smov (!%p442_p6, %s441_s19), 4 }
 0x109   : > { %s576_s28 = smul.u32 40, %s1117_s19 }
 0x10b   : > { %s446_s29 = ssub.s32 160, %s576_s28 }
 0x10c   : > { %s447_s30 = sshll.u32 %s446_s29, 4 }
 0x10d   : > { %448 = vsyncadd %s433_s6, %s447_s30  ;;  %p1040_p13 = scmp.ne.s32.totalorder %s576_s28, 0  ;;  %s605_s25 = smul.u32 160, %s859_s13 }
 0x10e   : > { %s454_s21 = sshll.u32 %s1008_s23, 4  ;;  %s1046_s26 = smul.u32 640, %s1117_s19  ;;  %s1051_s21 = int_to_ptr.vmem [resolvable:$true] %s454_s21 }
 0x10f   : > { %s452_s3 = scalar_lea.hbm %s1096_s2, %s605_s25  ;;  %s731_s8 = sshra.s32 %s1051_s21, 4  ;;  %s732_s8 = int_to_ptr.vmem [resolvable:$true] %s731_s8 }
 0x110   : > { %s456_s5 = sshll.u32 %s452_s3, 4  ;;  %s733_s14 = sshrl.u32 %s1046_s26, 4  ;;  %s1053_s5 = int_to_ptr.hbm [resolvable:$true] %s456_s5 }
 0x111   : > { %s769_s13 = sshll.u32 %s733_s14, 4  ;;  %s736_s17 = sadd.s32 1, %s733_s14 }
 0x112   : > { %p735_p11 = scmp.ne.s32.totalorder %s769_s13, %s1046_s26  ;;  %s820_s23 = smov [#allocation7]  }
 0x113   : > { %s742_s16 = scalar_lea.vmem %s820_s23, 320 }
 0x114   : > { %s1119_s17 = smov (!%p735_p11, %s736_s17), %s733_s14 }
 0x115   : > { %s738_s20 = scalar_lea.vmem %s732_s8, %s1119_s17 }
 0x116   : > { %p739_p2 = scmp.ne.s32.totalorder %s732_s8, %s738_s20  ;;  %p744_p10 = scmp.lt.s32.totalorder %s742_s16, %s738_s20 }
 0x118   : > { %p740_p5 = pnand %p739_p2, %p1040_p13 }
 0x11a   : > { %p741_p9 = pneg %p740_p5 }
 0x11c   : > { %p746_p1 = pnand %p744_p10, %p741_p9 }
 0x11e   : > { %749 = shalt.err (!%p746_p1)
}
 0x11f   : > { %s750_s19 = sshra.s32 %s1053_s5, 4  ;;  %s761_s25 = scalar_lea.hbm %s1096_s2, 280  ;;  %s751_s19 = int_to_ptr.hbm [resolvable:$true] %s750_s19 }
 0x120   : > { %s757_s28 = scalar_lea.hbm %s751_s19, %s1119_s17  ;;  %p762_p8 = scmp.lt.s32.totalorder %s751_s19, %s1096_s2 }
 0x121   : > { %p758_p0 = scmp.ne.s32.totalorder %s751_s19, %s757_s28  ;;  %p763_p4 = scmp.lt.s32.totalorder %s761_s25, %s757_s28 }
 0x123   : > { %p759_p3 = pnand %p758_p0, %p1040_p13  ;;  %p764_p12 = por %p763_p4, %p762_p8 }
 0x125   : > { %p760_p7 = pneg %p759_p3 }
 0x127   : > { %p765_p6 = pnand %p764_p12, %p760_p7 }
 0x129   : > { %768 = shalt.err (!%p765_p6)
}
 0x12a   : > { %s821_s3 = smov 640   ;;  %s822_s8 = smov 40  }
 0x12b   : > { %462 = dma.vmem_to_hbm [thread:$0]  (%p1040_p13), %s1051_s21, %s1046_s26, %s1053_s5, %s433_s6, %s821_s3, %s821_s3, %s822_s8  }
 0x12c PF: > { %s471_s14 = sand.u32 1, %s800_s9   ;;  %p1108_p11 = scmp.ne.s32.totalorder %s1102_s22, 0 }
 0x12d   : > { %p1109_p2 = scmp.ge.s32.totalorder %s812_s12, 2  ;;  %s472_s13 = scalar_lea.sflag [#allocation4], %s471_s14 }
 0x12f   : > { %p617_p5 = pnand %p1109_p2, %p1108_p11 }
 0x131   : > { %p618_p9 = pneg %p617_p5 }
 0x133   : > { %795 = dma.done.wait (%p618_p9), %s472_s13, 2560  }
 0x134   : > { %797 = vsyncadd (%p618_p9), %s472_s13, 4294964736  ;;  %p16_p10 = scmp.ge.s32.totalorder %s863_s15, 4   ;;  %s1110_s9 = smov %s804_s10 }
 0x135   : > { %s1111_s10 = smov %s808_s11  ;;  %s1112_s11 = smov %s875_s18 }
 0x136   : > { %s1113_s12 = smov %s863_s15  ;;  %18 = sbr.rel (!%p16_p10) target bundleno = 6 (0x6), region = 77 }
 0x13b   :  { %478 = vsyncpa [#allocation3], 1 }
 0x13c   :  { %480 = vsyncpa [#allocation3 + $0x1], 1 }
 0x13d   :  { %481 = vsyncpa [#allocation6], 1 }
 0x13e   :  { %482 = vsyncpa [#allocation4], 1 }
 0x13f   :  { %484 = vsyncpa [#allocation4 + $0x1], 1 }

</bundles_post_ra>
